<compile_context>
chip_gen: v7x
topology: tpu7x:2x2x1
jax: 0.10.0
libtpu: 0.0.40
codegen_flags: <defaults>
</compile_context>

<pallas_src>
import jax
import jax.numpy as jnp
from jax.experimental import pallas as pl
from jax.experimental.pallas import tpu as pltpu


def _round_up(x, n):
    return (x + n - 1) // n * n


# --------------------------------------------------------------------------
# Kernels
# --------------------------------------------------------------------------
def _mlp_kernel_d1(x_ref, w1_ref, b1_ref, w2_ref, b2_ref, o_ref):
    # x_ref : (TILE_M, D_in)  VMEM  -- streamed, double-buffered by BlockSpec
    # w1_ref: (D_in, H)       VMEM  -- resident across grid steps
    # b1_ref: (1, H)          VMEM  -- resident
    # w2_ref: (1, H)          VMEM  -- resident (second Linear as a row vector)
    # b2_ref: (1,)            SMEM  -- scalar bias
    # o_ref : (1, 1, TILE_M)  VMEM  -- M on the lane axis (dense when TILE_M>=128)
    h = jnp.dot(x_ref[...], w1_ref[...], preferred_element_type=jnp.float32)
    h = jnp.tanh(h + b1_ref[...])                                   # (TILE_M, H) f32
    # Second Linear (H -> 1): contract over H with the result landing with M on
    # the lane axis: (1, H) . (TILE_M, H)^T -> (1, TILE_M).  Keeps the store /
    # writeback DMA dense instead of a 1-lane-wide padded column block.
    y = jax.lax.dot_general(
        w2_ref[...], h,
        dimension_numbers=(((1,), (1,)), ((), ())),
        preferred_element_type=jnp.float32,
    )                                                               # (1, TILE_M)
    y = y + b2_ref[0]
    o_ref[0] = y.astype(o_ref.dtype)


def _mlp_kernel_general(x_ref, w1_ref, b1_ref, w2_ref, b2_ref, o_ref):
    # Fallback for output_size > 1: plain two-matmul MLP on a row tile.
    h = jnp.tanh(
        jnp.dot(x_ref[...], w1_ref[...], preferred_element_type=jnp.float32)
        + b1_ref[...]
    )
    y = jnp.dot(h, w2_ref[...], preferred_element_type=jnp.float32) + b2_ref[...]
    o_ref[...] = y.astype(o_ref.dtype)


# --------------------------------------------------------------------------
# Tile selection
# --------------------------------------------------------------------------
def _choose_tile_m(m, requested, tile_m_max=8192):
    """Pick a row-tile size (multiple of 8).

    VMEM accounting (lane-padded, f32): each x buffer is tile_m*128*4 B, x2 for
    double buffering, plus ~tile_m*128*4 B of h temp -> tile_m=8192 is ~12-16
    MiB, under the 48 MiB budget and v7x's 64 MiB physical VMEM.
    """
    if requested is not None:
        tm = min(requested, _round_up(max(m, 8), 8))
        return max(_round_up(tm, 8), 8)
    m8 = _round_up(max(m, 8), 8)
    if m8 <= 2048:
        # Small problem: a single tile covers it; step-overhead amortization
        # and megacore splitting are irrelevant at this size.
        return m8
    # Ensure at least 2 grid steps so dimension_semantics=("parallel",) can
    # actually shard row tiles across v7x's two TensorCores, capped so the
    # lane-padded buffers stay well inside the 64 MiB VMEM part.
    return min(tile_m_max, _round_up(-(-m // 2), 8))


# --------------------------------------------------------------------------
# Wrapper
# --------------------------------------------------------------------------
def output_forward(dec_output, w1, b1, w2, b2, *, tile_m=None,
                   compute_dtype=None, use_pallas=None):
    """Pallas forward pass of the `Output` MLP.

    dec_output: (..., D_in) float32
    w1: (D_in, H), b1: (H,), w2: (H, D_out), b2: (D_out,)
    returns: (..., D_out)
    """
    *lead, d_in = dec_output.shape
    m = 1
    for s in lead:
        m *= s
    hdim = w1.shape[1]
    d_out = w2.shape[1]
    out_dtype = dec_output.dtype

    if use_pallas is None:
        # At tiny M the whole problem is a few KB: kernel launch plus the
        # ~0.35us/step overhead dwarfs the work on every TPU generation, so
        # let XLA fuse the two small matmuls instead.
        use_pallas = m >= 256
    if not use_pallas:
        return (jnp.tanh(dec_output @ w1 + b1) @ w2 + b2).astype(out_dtype)

    x2d = dec_output.reshape(m, d_in)
    if compute_dtype is not None:
        # Optional bf16 stream: halves dominant HBM traffic on v5e/v6e.
        # Accumulation stays f32 via preferred_element_type inside the kernel.
        x2d = x2d.astype(compute_dtype)
        w1 = w1.astype(compute_dtype)

    tm = _choose_tile_m(m, tile_m)
    num_tiles = pl.cdiv(m, tm)   # ragged last tile handled by Pallas (no jnp.pad)

    # Constant index_maps -> weights stay VMEM-resident across all grid steps.
    def _resident(shape):
        return pl.BlockSpec(shape, lambda i: (0, 0))

    compiler_params = pltpu.CompilerParams(
        dimension_semantics=("parallel",),        # v7x: split row tiles over 2 TCs
        vmem_limit_bytes=48 * 1024 * 1024,        # fits v7x's 64 MiB; ample on v5e/v6e
    )

    x_bytes = int(x2d.dtype.itemsize)
    cost = pl.CostEstimate(
        flops=int(2 * m * d_in * hdim + 2 * m * hdim * d_out),
        transcendentals=int(m * hdim),
        bytes_accessed=int(m * d_in * x_bytes + m * d_out * 4
                           + (d_in * hdim + hdim + hdim * d_out + d_out) * 4),
    )

    if d_out == 1:
        out3d = pl.pallas_call(
            _mlp_kernel_d1,
            out_shape=jax.ShapeDtypeStruct((num_tiles, 1, tm), out_dtype),
            grid=(num_tiles,),
            in_specs=[
                pl.BlockSpec((tm, d_in), lambda i: (i, 0)),        # streamed x tile
                _resident((d_in, hdim)),                           # w1
                _resident((1, hdim)),                              # b1
                _resident((1, hdim)),                              # w2 as row
                pl.BlockSpec(memory_space=pltpu.MemorySpace.SMEM), # b2 scalar
            ],
            out_specs=pl.BlockSpec((1, 1, tm), lambda i: (i, 0, 0)),
            compiler_params=compiler_params,
            cost_estimate=cost,
        )(x2d, w1, b1.reshape(1, hdim), w2.reshape(1, hdim), b2.reshape(1))
        # Rows beyond m in the ragged last tile were computed from OOB garbage
        # input (trap-free) and are dropped here.
        out2d = out3d.reshape(num_tiles * tm, 1)[:m]
    else:
        out2d = pl.pallas_call(
            _mlp_kernel_general,
            out_shape=jax.ShapeDtypeStruct((m, d_out), out_dtype),
            grid=(num_tiles,),
            in_specs=[
                pl.BlockSpec((tm, d_in), lambda i: (i, 0)),
                _resident((d_in, hdim)),
                _resident((1, hdim)),
                _resident((hdim, d_out)),
                _resident((1, d_out)),
            ],
            out_specs=pl.BlockSpec((tm, d_out), lambda i: (i, 0)),
            compiler_params=compiler_params,
            cost_estimate=cost,
        )(x2d, w1, b1.reshape(1, hdim), w2, b2.reshape(1, d_out))

    return out2d.reshape(*lead, d_out)


def init_params(key, input_size=30, hidden_size=30, output_size=1):
    """Deterministic init mimicking torch.nn.Linear default U[-1/sqrt(fan_in), +]."""
    k1, k2, k3, k4 = jax.random.split(key, 4)
    lim1 = 1.0 / jnp.sqrt(jnp.float32(input_size))
    lim2 = 1.0 / jnp.sqrt(jnp.float32(hidden_size))
    # weights stored as (in_features, out_features)
    w1 = jax.random.uniform(k1, (input_size, hidden_size), jnp.float32, -lim1, lim1)
    b1 = jax.random.uniform(k2, (hidden_size,), jnp.float32, -lim1, lim1)
    w2 = jax.random.uniform(k3, (hidden_size, output_size), jnp.float32, -lim2, lim2)
    b2 = jax.random.uniform(k4, (output_size,), jnp.float32, -lim2, lim2)
    return w1, b1, w2, b2


if __name__ == "__main__":
    key = jax.random.PRNGKey(0)
    k_in, k_par, k_in2 = jax.random.split(key, 3)

    # Shapes consistent with the module: batch=2, seq=8, input_size=30.
    B, S, D_IN, H, D_OUT = 2, 8, 30, 30, 1
    dec_output = jax.random.normal(k_in, (B, S, D_IN), jnp.float32)
    w1, b1, w2, b2 = init_params(k_par, D_IN, H, D_OUT)

    # 1) Module-shaped input, forced through the Pallas path.
    out = output_forward(dec_output, w1, b1, w2, b2, use_pallas=True)
    out = jax.block_until_ready(out)
    ref = jnp.tanh(dec_output @ w1 + b1) @ w2 + b2
    assert out.shape == (B, S, D_OUT), out.shape
    assert jnp.allclose(out, ref, atol=1e-5, rtol=1e-5), "mismatch vs reference (small)"

    # 2) Multi-tile, ragged-M path: M=2010 with tile_m=512 -> 4 grid steps,
    #    last block reads OOB rows that are computed then sliced away.
    x_big = jax.random.normal(k_in2, (3, 670, D_IN), jnp.float32)
    out_big = output_forward(x_big, w1, b1, w2, b2, tile_m=512, use_pallas=True)
    out_big = jax.block_until_ready(out_big)
    ref_big = jnp.tanh(x_big @ w1 + b1) @ w2 + b2
    assert out_big.shape == (3, 670, D_OUT), out_big.shape
    assert jnp.allclose(out_big, ref_big, atol=1e-5, rtol=1e-5), "mismatch vs reference (ragged)"

    print("KERNEL_OK")
</pallas_src>

<mosaic_0001>
module attributes {stable_mosaic.version = 11 : i64} {
  func.func @_mlp_kernel_d1(%arg0: i32, %arg1: memref<16x30xf32, #tpu.memory_space<vmem>>, %arg2: memref<30x30xf32, #tpu.memory_space<vmem>>, %arg3: memref<1x30xf32, #tpu.memory_space<vmem>>, %arg4: memref<1x30xf32, #tpu.memory_space<vmem>>, %arg5: memref<1xf32, #tpu.memory_space<smem>>, %arg6: memref<1x1x16xf32, #tpu.memory_space<vmem>>) attributes {dimension_semantics = [#tpu.dimension_semantics<parallel>], iteration_bounds = array<i64: 1>, scalar_prefetch = 0 : i64, scratch_operands = 0 : i64, tpu.core_type = #tpu.core_type<tc>, window_params = [{transform_indices = @transform_0, window_bounds = array<i64: 16, 30>}, {pipeline_mode = #tpu.pipeline_mode<synchronous>, transform_indices = @transform_1, window_bounds = array<i64: 30, 30>}, {pipeline_mode = #tpu.pipeline_mode<synchronous>, transform_indices = @transform_2, window_bounds = array<i64: 1, 30>}, {pipeline_mode = #tpu.pipeline_mode<synchronous>, transform_indices = @transform_3, window_bounds = array<i64: 1, 30>}, {transform_indices = @transform_4, window_bounds = array<i64: 1>}, {transform_indices = @transform_5, window_bounds = array<i64: 1, 1, 16>}]} {
    %c0 = arith.constant 0 : index
    %c0_0 = arith.constant 0 : index
    %0 = vector.load %arg1[%c0, %c0_0] : memref<16x30xf32, #tpu.memory_space<vmem>>, vector<16x30xf32>
    %c0_1 = arith.constant 0 : index
    %c0_2 = arith.constant 0 : index
    %1 = vector.load %arg2[%c0_1, %c0_2] : memref<30x30xf32, #tpu.memory_space<vmem>>, vector<30x30xf32>
    %cst = arith.constant dense<0.000000e+00> : vector<16x30xf32>
    %2 = tpu.matmul %0, %1, %cst {dimension_numbers = #tpu.dot_dimension_numbers<[1], [0], [0], [1], [0, 0, 1, 1], [], []>} : vector<16x30xf32>, vector<30x30xf32>, vector<16x30xf32> -> vector<16x30xf32>
    %c0_3 = arith.constant 0 : index
    %c0_4 = arith.constant 0 : index
    %3 = vector.load %arg3[%c0_3, %c0_4] : memref<1x30xf32, #tpu.memory_space<vmem>>, vector<1x30xf32>
    %4 = vector.broadcast %3 : vector<1x30xf32> to vector<16x30xf32>
    %5 = arith.addf %2, %4 : vector<16x30xf32>
    %6 = math.tanh %5 : vector<16x30xf32>
    %c0_5 = arith.constant 0 : index
    %c0_6 = arith.constant 0 : index
    %7 = vector.load %arg4[%c0_5, %c0_6] : memref<1x30xf32, #tpu.memory_space<vmem>>, vector<1x30xf32>
    %cst_7 = arith.constant dense<0.000000e+00> : vector<1x16xf32>
    %8 = tpu.matmul %7, %6, %cst_7 {dimension_numbers = #tpu.dot_dimension_numbers<[1], [1], [0], [0], [0, 0, 1, 0], [], []>} : vector<1x30xf32>, vector<16x30xf32>, vector<1x16xf32> -> vector<1x16xf32>
    %c0_8 = arith.constant 0 : index
    %9 = memref.load %arg5[%c0_8] : memref<1xf32, #tpu.memory_space<smem>>
    %10 = vector.broadcast %9 : f32 to vector<1x16xf32>
    %11 = arith.addf %8, %10 : vector<1x16xf32>
    %c0_9 = arith.constant 0 : index
    %c0_10 = arith.constant 0 : index
    %c0_11 = arith.constant 0 : index
    %12 = vector.load %arg6[%c0_9, %c0_10, %c0_11] : memref<1x1x16xf32, #tpu.memory_space<vmem>>, vector<1x1x16xf32>
    %13 = vector.shape_cast %12 : vector<1x1x16xf32> to vector<1x16xf32>
    %14 = vector.shape_cast %11 : vector<1x16xf32> to vector<1x1x16xf32>
    tpu.vector_store %arg6[%c0_9, %c0_10, %c0_11], %14 {strides = array<i32>} : memref<1x1x16xf32, #tpu.memory_space<vmem>>, vector<1x1x16xf32>,
    return
  }
  func.func @transform_0(%arg0: i32) -> (i32, i32) {
    %c0_i32 = arith.constant 0 : i32
    %c0_i32_0 = arith.constant 0 : i32
    return %arg0, %c0_i32 : i32, i32
  }
  func.func @transform_1(%arg0: i32) -> (i32, i32) {
    %c0_i32 = arith.constant 0 : i32
    %c0_i32_0 = arith.constant 0 : i32
    %c0_i32_1 = arith.constant 0 : i32
    return %c0_i32, %c0_i32_0 : i32, i32
  }
  func.func @transform_2(%arg0: i32) -> (i32, i32) {
    %c0_i32 = arith.constant 0 : i32
    %c0_i32_0 = arith.constant 0 : i32
    %c0_i32_1 = arith.constant 0 : i32
    return %c0_i32, %c0_i32_0 : i32, i32
  }
  func.func @transform_3(%arg0: i32) -> (i32, i32) {
    %c0_i32 = arith.constant 0 : i32
    %c0_i32_0 = arith.constant 0 : i32
    %c0_i32_1 = arith.constant 0 : i32
    return %c0_i32, %c0_i32_0 : i32, i32
  }
  func.func @transform_4(%arg0: i32) -> i32 {
    %c0_i32 = arith.constant 0 : i32
    %c0_i32_0 = arith.constant 0 : i32
    return %c0_i32 : i32
  }
  func.func @transform_5(%arg0: i32) -> (i32, i32, i32) {
    %c0_i32 = arith.constant 0 : i32
    %c0_i32_0 = arith.constant 0 : i32
    %c0_i32_1 = arith.constant 0 : i32
    return %arg0, %c0_i32, %c0_i32_0 : i32, i32, i32
  }
}

</mosaic_0001>

<bundles_post_ra>
// kernel: tpu_custom_call.1
= control target key start
LH: loop header
LB: loop body
LE: loop exit
PB: predicated region body
PF: predicated region fallthrough
CT: control target
= control target key end

     0   :  { %11 = vsyncpa [#allocation4], 0  ;;  %s473_s0 = inlined_call_operand.hbm [shape: f32[16,30], index: 0, kind: input, shape index: {}]   ;;  %s474_s1 = inlined_call_operand.hbm [shape: f32[30,30], index: 1, kind: input, shape index: {}]   ;;  %s475_s2 = inlined_call_operand.vmem [shape: f32[1,30], index: 2, kind: input, shape index: {}]   ;;  %s476_s3 = inlined_call_operand.vmem [shape: f32[1,30], index: 3, kind: input, shape index: {}]   ;;  %s477_s4 = inlined_call_operand.<no memory space> [shape: f32[1], index: 4, kind: input, shape index: {}]   ;;  %s478_s5 = inlined_call_operand.hbm [shape: f32[1,1,16], index: 5, kind: output, shape index: {}]  }
   0x1   :  { %12 = vsyncpa [#allocation7], 0 }
   0x2   :  { %13 = vsyncpa [#allocation5], 0  ;;  %s384_s18 = smov [#allocation3]   ;;  %s312_s22 = scalar_lea.hbm %s473_s0, 256 }
   0x3   :  { %s19_s19 = sshll.u32 %s384_s18, 4  ;;  %p313_p0 = scmp.ne.s32.totalorder %s473_s0, %s312_s22  ;;  %s20_s19 = int_to_ptr.vmem [resolvable:$true] %s19_s19 }
   0x4   :  { %p316_p1 = scmp.lt.u32.totalorder %s312_s22, %s473_s0 }
   0x6   :  { %p318_p2 = pnand %p316_p1, %p313_p0 }
   0x8   :  { %321 = shalt.err (!%p318_p2)
}
   0x9   :  { %s322_s27 = scalar_lea.vmem %s20_s19, 256  ;;  %p327_p4 = scmp.lt.s32.totalorder %s20_s19, %s20_s19 }
   0xa   :  { %p323_p3 = scmp.ne.s32.totalorder %s20_s19, %s322_s27  ;;  %p328_p5 = scmp.lt.s32.totalorder %s322_s27, %s322_s27 }
   0xc   :  { %p329_p6 = por %p328_p5, %p327_p4 }
   0xe   :  { %p330_p7 = pnand %p329_p6, %p323_p3 }
  0x10   :  { %333 = shalt.err (!%p330_p7)
}
  0x11   :  { %s385_s28 = smov 128   ;;  %s386_s29 = smov 8  }
  0x12   :  { %25 = dma.hbm_to_vmem [thread:$0]  %s473_s0, 256, %s20_s19, [#allocation4], %s385_s28, %s385_s28, %s386_s29  }
  0x13   :  { %s387_s7 = smov [#allocation6]   ;;  %s334_s11 = scalar_lea.hbm %s474_s1, 512 }
  0x14   :  { %s31_s8 = sshll.u32 %s387_s7, 4  ;;  %p335_p8 = scmp.ne.s32.totalorder %s474_s1, %s334_s11  ;;  %s32_s8 = int_to_ptr.vmem [resolvable:$true] %s31_s8 }
  0x15   :  { %p338_p9 = scmp.lt.u32.totalorder %s334_s11, %s474_s1 }
  0x17   :  { %p340_p10 = pnand %p338_p9, %p335_p8 }
  0x19   :  { %343 = shalt.err (!%p340_p10)
}
  0x1a   :  { %s344_s16 = scalar_lea.vmem %s32_s8, 512  ;;  %p349_p12 = scmp.lt.s32.totalorder %s32_s8, %s32_s8 }
  0x1b   :  { %p345_p11 = scmp.ne.s32.totalorder %s32_s8, %s344_s16  ;;  %p350_p13 = scmp.lt.s32.totalorder %s344_s16, %s344_s16 }
  0x1d   :  { %p351_p0 = por %p350_p13, %p349_p12 }
  0x1f   :  { %p352_p1 = pnand %p351_p0, %p345_p11 }
  0x21   :  { %355 = shalt.err (!%p352_p1)
}
  0x22   :  { %37 = dma.hbm_to_vmem [thread:$0]  %s474_s1, 512, %s32_s8, [#allocation7], %s385_s28, %s385_s28, %s386_s29  }
  0x23   :  { %378 = dma.done.wait [#allocation4], 256  }
  0x24   :  { %379 = vsyncadd [#allocation4], 4294967040 }
  0x25   :  { %380 = dma.done.wait [#allocation7], 512  }
  0x26   :  { %381 = vsyncadd [#allocation7], 4294966784  ;;  %vm70_vm0 = vcmask 1045504   ;;  %vm63_vm1 = vcmask 244736   ;;  %v52_v0 = vld [vmem:[#allocation6] sm:$0xff]  ;;  %v53_v1 = vld [vmem:[#allocation6 + $0x8] sm:$0xff]  ;;  %v153_v19 = vstv %s477_s4 }
  0x27   :  { %v54_v2 = vld [vmem:[#allocation6 + $0x10] sm:$0xff]  ;;  %v285_v3 = vpack.c.bf16 %v53_v1, %v52_v0  ;;  %v55_v4 = vld [vmem:[#allocation6 + $0x18] sm:$0x3f]  ;;  %vm388_vm2 = vmmov 1   ;;  %v389_v8 = vmov 0.0|0.0   ;;  %vm390_vm4 = vmmov 0   ;;  %vm297_vm5 = vmpackc.low %vm63_vm1, %vm63_vm1 }
  0x28   :  { %v50_v5 = vld [vmem:[#allocation3] sm:$0xff]  ;;  %v289_v6 = vpack.c.bf16 %v55_v4, %v54_v2  ;;  %vm290_vm3 = vmpackc.low %vm70_vm0, %vm388_vm2  ;;  %v51_v7 = vld [vmem:[#allocation3 + $0x8] sm:$0xff]  ;;  %295 = vmatprep.subr.bf16.mxu1 %v389_v8  ;;  %v391_v9 = vmov 0.0   ;;  %s392_s22 = smov [#allocation8]   ;;  %vm233_vm6 = vcmask 122880  }
  0x29   :  { %275 = vmatprep.mubr.msk.f32.mxu0 %vm63_vm1, %v50_v5  ;;  %286 = vmatprep.subr.bf16.mxu0 %v285_v3  ;;  %v251_v10 = vld [vmem:[%s475_s2] ss:$0 sm:$0xff]  ;;  %s241_s23 = sshll.u32 %s392_s22, 4  ;;  %s242_s23 = int_to_ptr.vmem [resolvable:$true] %s241_s23 }
  0x2a   :  { %288 = vmatpush3.bf16.msra.mxu0 %v285_v3  ;;  %282 = vmatprep.mubr.msk.f32.mxu1 %vm390_vm4, %v391_v9  ;;  %v151_v18 = vld [vmem:[%s476_s3] sm:$0x1]  ;;  %s356_s24 = scalar_lea.vmem %s242_s23, 16  ;;  %s360_s25 = scalar_lea.vmem %s242_s23, 32 }
  0x2b   :  { %291 = vmatprep.subr.msk.bf16.mxu0 %vm290_vm3, %v289_v6  ;;  %p357_p2 = scmp.ne.s32.totalorder %s242_s23, %s356_s24  ;;  %p361_p3 = scmp.lt.s32.totalorder %s242_s23, %s242_s23 }
  0x2c   :  { %p362_p4 = scmp.lt.s32.totalorder %s360_s25, %s356_s24 }
  0x2e   :  { %294 = vmatpush3.bf16.msk.msra.mxu0 %vm290_vm3, %v289_v6  ;;  %p363_p5 = por %p362_p4, %p361_p3 }
  0x30   :  { %p364_p6 = pnand %p363_p5, %p357_p2 }
  0x31   :  { %276 = vmatmul.mubr.msk.f32.vlgmr.msra.gmra.mrb[0].mxu0 %vm63_vm1, %v51_v7 }
 0x104   :  { %v277_v11 = vpop.f32.mrb[0].mxu0 }
 0x105   :  { %v146_v12 = vadd.f32 %v277_v11, %v251_v10  ;;  %v140_v13 = vpop.f32.mrb[1].mxu0 }
 0x106   :  { %v141_v14 = vadd.f32 %v251_v10, %v140_v13 }
 0x107   :  { %308 = vtanh.f32 %v146_v12 }
 0x108   :  { %310 = vtanh.f32 %v141_v14 }
 0x111   :  { %v309_v15 = vpop.eup %308 }
 0x112   :  { %v311_v16 = vpop.eup %310 }
 0x113   :  { %v296_v17 = vpack.c.bf16 %v309_v15, %v311_v16 }
 0x115   :  { %298 = vmatpush3.bf16.xpose.msk.msra.mxu1 %vm297_vm5, %v296_v17 }
 0x11c   :  { %283 = vmatmul.mubr.msk.f32.vlgmr.msra.gmra.mrb[0].mxu1 %vm63_vm1, %v151_v18 }
 0x1ef   :  { %v229_v20 = vpop.f32.mrb[0].mxu1 }
 0x1f0   :  { %v230_v21 = vadd.f32 %v229_v20, %v153_v19  ;;  %v284_v22 = vpop.f32.mrb[1].mxu1 }
 0x1f2   :  { %234 = vst.msk [vmem:[#allocation8] sm:$0x1] %vm233_vm6, %v230_v21 }
 0x1f3   :  { %367 = shalt.err (!%p364_p6)
}
 0x1f4   :  { %s368_s4 = scalar_lea.hbm %s478_s5, 16 }
 0x1f5   :  { %p369_p7 = scmp.ne.s32.totalorder %s478_s5, %s368_s4  ;;  %p372_p8 = scmp.lt.u32.totalorder %s368_s4, %s478_s5 }
 0x1f7   :  { %p374_p9 = pnand %p372_p8, %p369_p7 }
 0x1f9   :  { %377 = shalt.err (!%p374_p9)
}
 0x1fa   :  { %244 = dma.vmem_to_hbm [thread:$0]  %s242_s23, 16, %s478_s5, [#allocation5]  }
 0x1fb   :  { %382 = dma.done.wait [#allocation5], 16  }
 0x1fc   :  { %383 = vsyncadd [#allocation5], 4294967280 }
 0x1fd   :  { %248 = vsyncpa [#allocation4], 1 }
 0x1fe   :  { %249 = vsyncpa [#allocation7], 1 }
 0x1ff   :  { %250 = vsyncpa [#allocation5], 1 }

</bundles_post_ra>
